<compile_context>
chip_gen: v7x
topology: tpu7x:2x2x1
jax: 0.10.0
libtpu: 0.0.40
codegen_flags: <defaults>
</compile_context>

<pallas_src>
import jax
import jax.numpy as jnp
from jax.experimental import pallas as pl
from jax.experimental.pallas import tpu as pltpu


def _lstm_fc_kernel(x_ref, wih_ref, whh_ref, b_ref, wfc_ref, bfc_ref, out_ref):
    # x_ref:  (S*Bp, F)   time-major rows, batch padded to Bp sublanes (VMEM)
    # wih_ref:(F, 4H)  whh_ref:(H, 4H)  b_ref:(1, 4H)   (g-gate cols pre-scaled by 2)
    # wfc_ref:(1, H)   bfc_ref:(1,) in SMEM   out_ref:(Bp, 1)
    Bp = out_ref.shape[0]
    S = x_ref.shape[0] // Bp
    H = whh_ref.shape[0]

    # Prologue: input projection for ALL timesteps in one MXU matmul, with the
    # combined (pre-scaled) LSTM bias folded in once.
    xproj = (jnp.dot(x_ref[...], wih_ref[...],
                     preferred_element_type=jnp.float32)
             + b_ref[...])                                   # (S*Bp, 4H)

    whh = whh_ref[...]                                       # (H, 4H), lives in vregs

    # Recurrent state carried as values (vregs) — no VMEM round-trips.
    h = jnp.zeros((Bp, H), dtype=jnp.float32)
    c = jnp.zeros((Bp, H), dtype=jnp.float32)

    # Fully unrolled at trace time: S is small and static, so the xproj row
    # slices (8-sublane aligned) and gate slices stay static — only the
    # h @ W_hh^T matmul and two EUP ops sit on the serial dependence chain.
    for t in range(S):
        gates = xproj[t * Bp:(t + 1) * Bp, :] + jnp.dot(
            h, whh, preferred_element_type=jnp.float32)      # (Bp, 4H) = one f32 vreg
        # Single EUP sigmoid over the whole gate vreg. PyTorch gate order
        # [i, f, g, o]; the g columns were pre-scaled by 2 in the wrapper so
        # tanh(g) = 2*sigmoid(2g) - 1 comes out of the same sigmoid pass.
        sig = jax.nn.sigmoid(gates)
        i_g = sig[:, 0 * H:1 * H]
        f_g = sig[:, 1 * H:2 * H]
        g_g = 2.0 * sig[:, 2 * H:3 * H] - 1.0
        o_g = sig[:, 3 * H:4 * H]
        c = f_g * c + i_g * g_g
        h = o_g * jnp.tanh(c)

    # fc(output[-1]) with linear activation. Out-features = 1, so use a VPU
    # multiply + cross-lane reduce rather than an N=1 MXU push/pop; add the
    # SMEM scalar bias at the store.
    y = jnp.sum(h * wfc_ref[...], axis=-1, keepdims=True) + bfc_ref[0]
    out_ref[...] = y.astype(out_ref.dtype)


@jax.jit
def new_lstm_module_forward(x, w_ih, w_hh, b_ih, b_hh, w_fc, b_fc):
    """x: (S, B, F) float32. Returns (B, 1) float32."""
    S, B, F = x.shape
    H4 = w_ih.shape[0]
    H = H4 // 4

    # Pad batch to a full 8-sublane group (zeros; padded rows are independent
    # and sliced off afterwards), then flatten time-major to (S*Bp, F).
    Bp = max(8, ((B + 7) // 8) * 8)
    x_p = jnp.pad(x, ((0, 0), (0, Bp - B), (0, 0)))
    x2d = x_p.reshape(S * Bp, F)

    # Glue (fused under jit): transpose weights, combine biases, and pre-scale
    # the g-gate columns by 2 so the kernel can use tanh(x) = 2*sigmoid(2x)-1
    # with a single sigmoid pass over the full gate vreg.
    g_scale = jnp.concatenate([
        jnp.ones((2 * H,), jnp.float32),
        jnp.full((H,), 2.0, jnp.float32),
        jnp.ones((H,), jnp.float32),
    ])                                            # (4H,)
    w_ih_t = jnp.transpose(w_ih) * g_scale        # (F, 4H)
    w_hh_t = jnp.transpose(w_hh) * g_scale        # (H, 4H)
    b = ((b_ih + b_hh) * g_scale).reshape(1, 4 * H)   # (1, 4H)
    w_fc_row = w_fc.reshape(1, H)                 # (1, H)
    b_fc_1d = b_fc.reshape(1)                     # (1,) -> SMEM scalar

    out = pl.pallas_call(
        _lstm_fc_kernel,
        out_shape=jax.ShapeDtypeStruct((Bp, 1), jnp.float32),
        in_specs=[
            pl.BlockSpec(memory_space=pltpu.MemorySpace.VMEM),   # x2d (all timesteps)
            pl.BlockSpec(memory_space=pltpu.MemorySpace.VMEM),   # W_ih^T (g-scaled)
            pl.BlockSpec(memory_space=pltpu.MemorySpace.VMEM),   # W_hh^T (g-scaled)
            pl.BlockSpec(memory_space=pltpu.MemorySpace.VMEM),   # combined bias
            pl.BlockSpec(memory_space=pltpu.MemorySpace.VMEM),   # W_fc row
            pl.BlockSpec(memory_space=pltpu.MemorySpace.SMEM),   # b_fc scalar
        ],
        out_specs=pl.BlockSpec(memory_space=pltpu.MemorySpace.VMEM),
    )(x2d, w_ih_t, w_hh_t, b, w_fc_row, b_fc_1d)

    return out[:B]


def _reference_forward(x, w_ih, w_hh, b_ih, b_hh, w_fc, b_fc):
    """Plain-JAX reference of the PyTorch forward, for sanity checking."""
    S, B, F = x.shape
    H = w_hh.shape[1]
    h = jnp.zeros((B, H), jnp.float32)
    c = jnp.zeros((B, H), jnp.float32)

    def step(carry, x_t):
        h, c = carry
        gates = x_t @ w_ih.T + h @ w_hh.T + b_ih + b_hh
        i = jax.nn.sigmoid(gates[:, 0 * H:1 * H])
        f = jax.nn.sigmoid(gates[:, 1 * H:2 * H])
        g = jnp.tanh(gates[:, 2 * H:3 * H])
        o = jax.nn.sigmoid(gates[:, 3 * H:4 * H])
        c = f * c + i * g
        h = o * jnp.tanh(c)
        return (h, c), h

    (h, c), _ = jax.lax.scan(step, (h, c), x)
    return h @ w_fc.T + b_fc


if __name__ == "__main__":
    # Small shapes consistent with the module: seq=8, batch=2, n_features=4, hidden=32
    S, B, F, H = 8, 2, 4, 32

    key = jax.random.PRNGKey(0)
    ks = jax.random.split(key, 8)
    bound = 1.0 / jnp.sqrt(H)   # PyTorch-style uniform init bound

    x = jax.random.normal(ks[0], (S, B, F), dtype=jnp.float32)
    w_ih = jax.random.uniform(ks[1], (4 * H, F), minval=-bound, maxval=bound, dtype=jnp.float32)
    w_hh = jax.random.uniform(ks[2], (4 * H, H), minval=-bound, maxval=bound, dtype=jnp.float32)
    b_ih = jax.random.uniform(ks[3], (4 * H,), minval=-bound, maxval=bound, dtype=jnp.float32)
    b_hh = jax.random.uniform(ks[4], (4 * H,), minval=-bound, maxval=bound, dtype=jnp.float32)
    w_fc = jax.random.uniform(ks[5], (1, H), minval=-bound, maxval=bound, dtype=jnp.float32)
    b_fc = jax.random.uniform(ks[6], (1,), minval=-bound, maxval=bound, dtype=jnp.float32)

    out = new_lstm_module_forward(x, w_ih, w_hh, b_ih, b_hh, w_fc, b_fc)
    out = jax.block_until_ready(out)

    ref = _reference_forward(x, w_ih, w_hh, b_ih, b_hh, w_fc, b_fc)
    assert out.shape == (B, 1), out.shape
    assert jnp.allclose(out, ref, atol=1e-5, rtol=1e-5), (out, ref)

    print("KERNEL_OK")
</pallas_src>

<mosaic_0001>
module attributes {stable_mosaic.version = 11 : i64} {
  func.func @_lstm_fc_kernel(%arg0: memref<64x4xf32, #tpu.memory_space<vmem>>, %arg1: memref<4x128xf32, #tpu.memory_space<vmem>>, %arg2: memref<32x128xf32, #tpu.memory_space<vmem>>, %arg3: memref<1x128xf32, #tpu.memory_space<vmem>>, %arg4: memref<1x32xf32, #tpu.memory_space<vmem>>, %arg5: memref<1xf32, #tpu.memory_space<smem>>, %arg6: memref<8x1xf32, #tpu.memory_space<vmem>>) attributes {dimension_semantics = [], scalar_prefetch = 0 : i64, scratch_operands = 0 : i64, tpu.core_type = #tpu.core_type<tc>} {
    %c0 = arith.constant 0 : index
    %c0_0 = arith.constant 0 : index
    %0 = vector.load %arg0[%c0, %c0_0] : memref<64x4xf32, #tpu.memory_space<vmem>>, vector<64x4xf32>
    %c0_1 = arith.constant 0 : index
    %c0_2 = arith.constant 0 : index
    %1 = vector.load %arg1[%c0_1, %c0_2] : memref<4x128xf32, #tpu.memory_space<vmem>>, vector<4x128xf32>
    %cst = arith.constant dense<0.000000e+00> : vector<64x128xf32>
    %2 = tpu.matmul %0, %1, %cst {dimension_numbers = #tpu.dot_dimension_numbers<[1], [0], [0], [1], [0, 0, 1, 1], [], []>} : vector<64x4xf32>, vector<4x128xf32>, vector<64x128xf32> -> vector<64x128xf32>
    %c0_3 = arith.constant 0 : index
    %c0_4 = arith.constant 0 : index
    %3 = vector.load %arg3[%c0_3, %c0_4] : memref<1x128xf32, #tpu.memory_space<vmem>>, vector<1x128xf32>
    %4 = vector.broadcast %3 : vector<1x128xf32> to vector<64x128xf32>
    %5 = arith.addf %2, %4 : vector<64x128xf32>
    %c0_5 = arith.constant 0 : index
    %c0_6 = arith.constant 0 : index
    %6 = vector.load %arg2[%c0_5, %c0_6] : memref<32x128xf32, #tpu.memory_space<vmem>>, vector<32x128xf32>
    %cst_7 = arith.constant 0.000000e+00 : f32
    %7 = vector.broadcast %cst_7 : f32 to vector<8x32xf32>
    %cst_8 = arith.constant 0.000000e+00 : f32
    %8 = vector.broadcast %cst_8 : f32 to vector<8x32xf32>
    %9 = vector.extract_strided_slice %5 {offsets = [0, 0], sizes = [8, 128], strides = [1, 1]} : vector<64x128xf32> to vector<8x128xf32>
    %cst_9 = arith.constant dense<0.000000e+00> : vector<8x128xf32>
    %10 = tpu.matmul %7, %6, %cst_9 {dimension_numbers = #tpu.dot_dimension_numbers<[1], [0], [0], [1], [0, 0, 1, 1], [], []>} : vector<8x32xf32>, vector<32x128xf32>, vector<8x128xf32> -> vector<8x128xf32>
    %11 = arith.addf %9, %10 : vector<8x128xf32>
    %12 = arith.negf %11 : vector<8x128xf32>
    %13 = math.exp %12 : vector<8x128xf32>
    %cst_10 = arith.constant 1.000000e+00 : f32
    %14 = vector.broadcast %cst_10 : f32 to vector<8x128xf32>
    %15 = arith.addf %14, %13 : vector<8x128xf32>
    %16 = arith.divf %14, %15 : vector<8x128xf32>
    %17 = vector.extract_strided_slice %16 {offsets = [0, 0], sizes = [8, 32], strides = [1, 1]} : vector<8x128xf32> to vector<8x32xf32>
    %18 = vector.extract_strided_slice %16 {offsets = [0, 32], sizes = [8, 32], strides = [1, 1]} : vector<8x128xf32> to vector<8x32xf32>
    %19 = vector.extract_strided_slice %16 {offsets = [0, 64], sizes = [8, 32], strides = [1, 1]} : vector<8x128xf32> to vector<8x32xf32>
    %cst_11 = arith.constant 2.000000e+00 : f32
    %20 = vector.broadcast %cst_11 : f32 to vector<8x32xf32>
    %21 = arith.mulf %20, %19 : vector<8x32xf32>
    %cst_12 = arith.constant 1.000000e+00 : f32
    %22 = vector.broadcast %cst_12 : f32 to vector<8x32xf32>
    %23 = arith.subf %21, %22 : vector<8x32xf32>
    %24 = vector.extract_strided_slice %16 {offsets = [0, 96], sizes = [8, 32], strides = [1, 1]} : vector<8x128xf32> to vector<8x32xf32>
    %25 = arith.mulf %18, %8 : vector<8x32xf32>
    %26 = arith.mulf %17, %23 : vector<8x32xf32>
    %27 = arith.addf %25, %26 : vector<8x32xf32>
    %28 = math.tanh %27 : vector<8x32xf32>
    %29 = arith.mulf %24, %28 : vector<8x32xf32>
    %30 = vector.extract_strided_slice %5 {offsets = [8, 0], sizes = [8, 128], strides = [1, 1]} : vector<64x128xf32> to vector<8x128xf32>
    %cst_13 = arith.constant dense<0.000000e+00> : vector<8x128xf32>
    %31 = tpu.matmul %29, %6, %cst_13 {dimension_numbers = #tpu.dot_dimension_numbers<[1], [0], [0], [1], [0, 0, 1, 1], [], []>} : vector<8x32xf32>, vector<32x128xf32>, vector<8x128xf32> -> vector<8x128xf32>
    %32 = arith.addf %30, %31 : vector<8x128xf32>
    %33 = arith.negf %32 : vector<8x128xf32>
    %34 = math.exp %33 : vector<8x128xf32>
    %cst_14 = arith.constant 1.000000e+00 : f32
    %35 = vector.broadcast %cst_14 : f32 to vector<8x128xf32>
    %36 = arith.addf %35, %34 : vector<8x128xf32>
    %37 = arith.divf %35, %36 : vector<8x128xf32>
    %38 = vector.extract_strided_slice %37 {offsets = [0, 0], sizes = [8, 32], strides = [1, 1]} : vector<8x128xf32> to vector<8x32xf32>
    %39 = vector.extract_strided_slice %37 {offsets = [0, 32], sizes = [8, 32], strides = [1, 1]} : vector<8x128xf32> to vector<8x32xf32>
    %40 = vector.extract_strided_slice %37 {offsets = [0, 64], sizes = [8, 32], strides = [1, 1]} : vector<8x128xf32> to vector<8x32xf32>
    %cst_15 = arith.constant 2.000000e+00 : f32
    %41 = vector.broadcast %cst_15 : f32 to vector<8x32xf32>
    %42 = arith.mulf %41, %40 : vector<8x32xf32>
    %cst_16 = arith.constant 1.000000e+00 : f32
    %43 = vector.broadcast %cst_16 : f32 to vector<8x32xf32>
    %44 = arith.subf %42, %43 : vector<8x32xf32>
    %45 = vector.extract_strided_slice %37 {offsets = [0, 96], sizes = [8, 32], strides = [1, 1]} : vector<8x128xf32> to vector<8x32xf32>
    %46 = arith.mulf %39, %27 : vector<8x32xf32>
    %47 = arith.mulf %38, %44 : vector<8x32xf32>
    %48 = arith.addf %46, %47 : vector<8x32xf32>
    %49 = math.tanh %48 : vector<8x32xf32>
    %50 = arith.mulf %45, %49 : vector<8x32xf32>
    %51 = vector.extract_strided_slice %5 {offsets = [16, 0], sizes = [8, 128], strides = [1, 1]} : vector<64x128xf32> to vector<8x128xf32>
    %cst_17 = arith.constant dense<0.000000e+00> : vector<8x128xf32>
    %52 = tpu.matmul %50, %6, %cst_17 {dimension_numbers = #tpu.dot_dimension_numbers<[1], [0], [0], [1], [0, 0, 1, 1], [], []>} : vector<8x32xf32>, vector<32x128xf32>, vector<8x128xf32> -> vector<8x128xf32>
    %53 = arith.addf %51, %52 : vector<8x128xf32>
    %54 = arith.negf %53 : vector<8x128xf32>
    %55 = math.exp %54 : vector<8x128xf32>
    %cst_18 = arith.constant 1.000000e+00 : f32
    %56 = vector.broadcast %cst_18 : f32 to vector<8x128xf32>
    %57 = arith.addf %56, %55 : vector<8x128xf32>
    %58 = arith.divf %56, %57 : vector<8x128xf32>
    %59 = vector.extract_strided_slice %58 {offsets = [0, 0], sizes = [8, 32], strides = [1, 1]} : vector<8x128xf32> to vector<8x32xf32>
    %60 = vector.extract_strided_slice %58 {offsets = [0, 32], sizes = [8, 32], strides = [1, 1]} : vector<8x128xf32> to vector<8x32xf32>
    %61 = vector.extract_strided_slice %58 {offsets = [0, 64], sizes = [8, 32], strides = [1, 1]} : vector<8x128xf32> to vector<8x32xf32>
    %cst_19 = arith.constant 2.000000e+00 : f32
    %62 = vector.broadcast %cst_19 : f32 to vector<8x32xf32>
    %63 = arith.mulf %62, %61 : vector<8x32xf32>
    %cst_20 = arith.constant 1.000000e+00 : f32
    %64 = vector.broadcast %cst_20 : f32 to vector<8x32xf32>
    %65 = arith.subf %63, %64 : vector<8x32xf32>
    %66 = vector.extract_strided_slice %58 {offsets = [0, 96], sizes = [8, 32], strides = [1, 1]} : vector<8x128xf32> to vector<8x32xf32>
    %67 = arith.mulf %60, %48 : vector<8x32xf32>
    %68 = arith.mulf %59, %65 : vector<8x32xf32>
    %69 = arith.addf %67, %68 : vector<8x32xf32>
    %70 = math.tanh %69 : vector<8x32xf32>
    %71 = arith.mulf %66, %70 : vector<8x32xf32>
    %72 = vector.extract_strided_slice %5 {offsets = [24, 0], sizes = [8, 128], strides = [1, 1]} : vector<64x128xf32> to vector<8x128xf32>
    %cst_21 = arith.constant dense<0.000000e+00> : vector<8x128xf32>
    %73 = tpu.matmul %71, %6, %cst_21 {dimension_numbers = #tpu.dot_dimension_numbers<[1], [0], [0], [1], [0, 0, 1, 1], [], []>} : vector<8x32xf32>, vector<32x128xf32>, vector<8x128xf32> -> vector<8x128xf32>
    %74 = arith.addf %72, %73 : vector<8x128xf32>
    %75 = arith.negf %74 : vector<8x128xf32>
    %76 = math.exp %75 : vector<8x128xf32>
    %cst_22 = arith.constant 1.000000e+00 : f32
    %77 = vector.broadcast %cst_22 : f32 to vector<8x128xf32>
    %78 = arith.addf %77, %76 : vector<8x128xf32>
    %79 = arith.divf %77, %78 : vector<8x128xf32>
    %80 = vector.extract_strided_slice %79 {offsets = [0, 0], sizes = [8, 32], strides = [1, 1]} : vector<8x128xf32> to vector<8x32xf32>
    %81 = vector.extract_strided_slice %79 {offsets = [0, 32], sizes = [8, 32], strides = [1, 1]} : vector<8x128xf32> to vector<8x32xf32>
    %82 = vector.extract_strided_slice %79 {offsets = [0, 64], sizes = [8, 32], strides = [1, 1]} : vector<8x128xf32> to vector<8x32xf32>
    %cst_23 = arith.constant 2.000000e+00 : f32
    %83 = vector.broadcast %cst_23 : f32 to vector<8x32xf32>
    %84 = arith.mulf %83, %82 : vector<8x32xf32>
    %cst_24 = arith.constant 1.000000e+00 : f32
    %85 = vector.broadcast %cst_24 : f32 to vector<8x32xf32>
    %86 = arith.subf %84, %85 : vector<8x32xf32>
    %87 = vector.extract_strided_slice %79 {offsets = [0, 96], sizes = [8, 32], strides = [1, 1]} : vector<8x128xf32> to vector<8x32xf32>
    %88 = arith.mulf %81, %69 : vector<8x32xf32>
    %89 = arith.mulf %80, %86 : vector<8x32xf32>
    %90 = arith.addf %88, %89 : vector<8x32xf32>
    %91 = math.tanh %90 : vector<8x32xf32>
    %92 = arith.mulf %87, %91 : vector<8x32xf32>
    %93 = vector.extract_strided_slice %5 {offsets = [32, 0], sizes = [8, 128], strides = [1, 1]} : vector<64x128xf32> to vector<8x128xf32>
    %cst_25 = arith.constant dense<0.000000e+00> : vector<8x128xf32>
    %94 = tpu.matmul %92, %6, %cst_25 {dimension_numbers = #tpu.dot_dimension_numbers<[1], [0], [0], [1], [0, 0, 1, 1], [], []>} : vector<8x32xf32>, vector<32x128xf32>, vector<8x128xf32> -> vector<8x128xf32>
    %95 = arith.addf %93, %94 : vector<8x128xf32>
    %96 = arith.negf %95 : vector<8x128xf32>
    %97 = math.exp %96 : vector<8x128xf32>
    %cst_26 = arith.constant 1.000000e+00 : f32
    %98 = vector.broadcast %cst_26 : f32 to vector<8x128xf32>
    %99 = arith.addf %98, %97 : vector<8x128xf32>
    %100 = arith.divf %98, %99 : vector<8x128xf32>
    %101 = vector.extract_strided_slice %100 {offsets = [0, 0], sizes = [8, 32], strides = [1, 1]} : vector<8x128xf32> to vector<8x32xf32>
    %102 = vector.extract_strided_slice %100 {offsets = [0, 32], sizes = [8, 32], strides = [1, 1]} : vector<8x128xf32> to vector<8x32xf32>
    %103 = vector.extract_strided_slice %100 {offsets = [0, 64], sizes = [8, 32], strides = [1, 1]} : vector<8x128xf32> to vector<8x32xf32>
    %cst_27 = arith.constant 2.000000e+00 : f32
    %104 = vector.broadcast %cst_27 : f32 to vector<8x32xf32>
    %105 = arith.mulf %104, %103 : vector<8x32xf32>
    %cst_28 = arith.constant 1.000000e+00 : f32
    %106 = vector.broadcast %cst_28 : f32 to vector<8x32xf32>
    %107 = arith.subf %105, %106 : vector<8x32xf32>
    %108 = vector.extract_strided_slice %100 {offsets = [0, 96], sizes = [8, 32], strides = [1, 1]} : vector<8x128xf32> to vector<8x32xf32>
    %109 = arith.mulf %102, %90 : vector<8x32xf32>
    %110 = arith.mulf %101, %107 : vector<8x32xf32>
    %111 = arith.addf %109, %110 : vector<8x32xf32>
    %112 = math.tanh %111 : vector<8x32xf32>
    %113 = arith.mulf %108, %112 : vector<8x32xf32>
    %114 = vector.extract_strided_slice %5 {offsets = [40, 0], sizes = [8, 128], strides = [1, 1]} : vector<64x128xf32> to vector<8x128xf32>
    %cst_29 = arith.constant dense<0.000000e+00> : vector<8x128xf32>
    %115 = tpu.matmul %113, %6, %cst_29 {dimension_numbers = #tpu.dot_dimension_numbers<[1], [0], [0], [1], [0, 0, 1, 1], [], []>} : vector<8x32xf32>, vector<32x128xf32>, vector<8x128xf32> -> vector<8x128xf32>
    %116 = arith.addf %114, %115 : vector<8x128xf32>
    %117 = arith.negf %116 : vector<8x128xf32>
    %118 = math.exp %117 : vector<8x128xf32>
    %cst_30 = arith.constant 1.000000e+00 : f32
    %119 = vector.broadcast %cst_30 : f32 to vector<8x128xf32>
    %120 = arith.addf %119, %118 : vector<8x128xf32>
    %121 = arith.divf %119, %120 : vector<8x128xf32>
    %122 = vector.extract_strided_slice %121 {offsets = [0, 0], sizes = [8, 32], strides = [1, 1]} : vector<8x128xf32> to vector<8x32xf32>
    %123 = vector.extract_strided_slice %121 {offsets = [0, 32], sizes = [8, 32], strides = [1, 1]} : vector<8x128xf32> to vector<8x32xf32>
    %124 = vector.extract_strided_slice %121 {offsets = [0, 64], sizes = [8, 32], strides = [1, 1]} : vector<8x128xf32> to vector<8x32xf32>
    %cst_31 = arith.constant 2.000000e+00 : f32
    %125 = vector.broadcast %cst_31 : f32 to vector<8x32xf32>
    %126 = arith.mulf %125, %124 : vector<8x32xf32>
    %cst_32 = arith.constant 1.000000e+00 : f32
    %127 = vector.broadcast %cst_32 : f32 to vector<8x32xf32>
    %128 = arith.subf %126, %127 : vector<8x32xf32>
    %129 = vector.extract_strided_slice %121 {offsets = [0, 96], sizes = [8, 32], strides = [1, 1]} : vector<8x128xf32> to vector<8x32xf32>
    %130 = arith.mulf %123, %111 : vector<8x32xf32>
    %131 = arith.mulf %122, %128 : vector<8x32xf32>
    %132 = arith.addf %130, %131 : vector<8x32xf32>
    %133 = math.tanh %132 : vector<8x32xf32>
    %134 = arith.mulf %129, %133 : vector<8x32xf32>
    %135 = vector.extract_strided_slice %5 {offsets = [48, 0], sizes = [8, 128], strides = [1, 1]} : vector<64x128xf32> to vector<8x128xf32>
    %cst_33 = arith.constant dense<0.000000e+00> : vector<8x128xf32>
    %136 = tpu.matmul %134, %6, %cst_33 {dimension_numbers = #tpu.dot_dimension_numbers<[1], [0], [0], [1], [0, 0, 1, 1], [], []>} : vector<8x32xf32>, vector<32x128xf32>, vector<8x128xf32> -> vector<8x128xf32>
    %137 = arith.addf %135, %136 : vector<8x128xf32>
    %138 = arith.negf %137 : vector<8x128xf32>
    %139 = math.exp %138 : vector<8x128xf32>
    %cst_34 = arith.constant 1.000000e+00 : f32
    %140 = vector.broadcast %cst_34 : f32 to vector<8x128xf32>
    %141 = arith.addf %140, %139 : vector<8x128xf32>
    %142 = arith.divf %140, %141 : vector<8x128xf32>
    %143 = vector.extract_strided_slice %142 {offsets = [0, 0], sizes = [8, 32], strides = [1, 1]} : vector<8x128xf32> to vector<8x32xf32>
    %144 = vector.extract_strided_slice %142 {offsets = [0, 32], sizes = [8, 32], strides = [1, 1]} : vector<8x128xf32> to vector<8x32xf32>
    %145 = vector.extract_strided_slice %142 {offsets = [0, 64], sizes = [8, 32], strides = [1, 1]} : vector<8x128xf32> to vector<8x32xf32>
    %cst_35 = arith.constant 2.000000e+00 : f32
    %146 = vector.broadcast %cst_35 : f32 to vector<8x32xf32>
    %147 = arith.mulf %146, %145 : vector<8x32xf32>
    %cst_36 = arith.constant 1.000000e+00 : f32
    %148 = vector.broadcast %cst_36 : f32 to vector<8x32xf32>
    %149 = arith.subf %147, %148 : vector<8x32xf32>
    %150 = vector.extract_strided_slice %142 {offsets = [0, 96], sizes = [8, 32], strides = [1, 1]} : vector<8x128xf32> to vector<8x32xf32>
    %151 = arith.mulf %144, %132 : vector<8x32xf32>
    %152 = arith.mulf %143, %149 : vector<8x32xf32>
    %153 = arith.addf %151, %152 : vector<8x32xf32>
    %154 = math.tanh %153 : vector<8x32xf32>
    %155 = arith.mulf %150, %154 : vector<8x32xf32>
    %156 = vector.extract_strided_slice %5 {offsets = [56, 0], sizes = [8, 128], strides = [1, 1]} : vector<64x128xf32> to vector<8x128xf32>
    %cst_37 = arith.constant dense<0.000000e+00> : vector<8x128xf32>
    %157 = tpu.matmul %155, %6, %cst_37 {dimension_numbers = #tpu.dot_dimension_numbers<[1], [0], [0], [1], [0, 0, 1, 1], [], []>} : vector<8x32xf32>, vector<32x128xf32>, vector<8x128xf32> -> vector<8x128xf32>
    %158 = arith.addf %156, %157 : vector<8x128xf32>
    %159 = arith.negf %158 : vector<8x128xf32>
    %160 = math.exp %159 : vector<8x128xf32>
    %cst_38 = arith.constant 1.000000e+00 : f32
    %161 = vector.broadcast %cst_38 : f32 to vector<8x128xf32>
    %162 = arith.addf %161, %160 : vector<8x128xf32>
    %163 = arith.divf %161, %162 : vector<8x128xf32>
    %164 = vector.extract_strided_slice %163 {offsets = [0, 0], sizes = [8, 32], strides = [1, 1]} : vector<8x128xf32> to vector<8x32xf32>
    %165 = vector.extract_strided_slice %163 {offsets = [0, 32], sizes = [8, 32], strides = [1, 1]} : vector<8x128xf32> to vector<8x32xf32>
    %166 = vector.extract_strided_slice %163 {offsets = [0, 64], sizes = [8, 32], strides = [1, 1]} : vector<8x128xf32> to vector<8x32xf32>
    %cst_39 = arith.constant 2.000000e+00 : f32
    %167 = vector.broadcast %cst_39 : f32 to vector<8x32xf32>
    %168 = arith.mulf %167, %166 : vector<8x32xf32>
    %cst_40 = arith.constant 1.000000e+00 : f32
    %169 = vector.broadcast %cst_40 : f32 to vector<8x32xf32>
    %170 = arith.subf %168, %169 : vector<8x32xf32>
    %171 = vector.extract_strided_slice %163 {offsets = [0, 96], sizes = [8, 32], strides = [1, 1]} : vector<8x128xf32> to vector<8x32xf32>
    %172 = arith.mulf %165, %153 : vector<8x32xf32>
    %173 = arith.mulf %164, %170 : vector<8x32xf32>
    %174 = arith.addf %172, %173 : vector<8x32xf32>
    %175 = math.tanh %174 : vector<8x32xf32>
    %176 = arith.mulf %171, %175 : vector<8x32xf32>
    %c0_41 = arith.constant 0 : index
    %c0_42 = arith.constant 0 : index
    %177 = vector.load %arg4[%c0_41, %c0_42] : memref<1x32xf32, #tpu.memory_space<vmem>>, vector<1x32xf32>
    %178 = vector.broadcast %177 : vector<1x32xf32> to vector<8x32xf32>
    %179 = arith.mulf %176, %178 : vector<8x32xf32>
    %cst_43 = arith.constant dense<0.000000e+00> : vector<8xf32>
    %180 = vector.multi_reduction <add>, %179, %cst_43 [1] : vector<8x32xf32> to vector<8xf32>
    %181 = vector.shape_cast %180 : vector<8xf32> to vector<8x1xf32>
    %c0_44 = arith.constant 0 : index
    %182 = memref.load %arg5[%c0_44] : memref<1xf32, #tpu.memory_space<smem>>
    %183 = vector.broadcast %182 : f32 to vector<8x1xf32>
    %184 = arith.addf %181, %183 : vector<8x1xf32>
    %c0_45 = arith.constant 0 : index
    %c0_46 = arith.constant 0 : index
    %185 = vector.load %arg6[%c0_45, %c0_46] : memref<8x1xf32, #tpu.memory_space<vmem>>, vector<8x1xf32>
    tpu.vector_store %arg6[%c0_45, %c0_46], %184 {strides = array<i32>} : memref<8x1xf32, #tpu.memory_space<vmem>>, vector<8x1xf32>,
    return
  }
}

</mosaic_0001>

<bundles_post_ra>
// kernel: new_lstm_module_forward.1
= control target key start
LH: loop header
LB: loop body
LE: loop exit
PB: predicated region body
PF: predicated region fallthrough
CT: control target
= control target key end

     0   :  { %vm65_vm0 = vcmask 1043456   ;;  %vm40_vm1 = vcmask 31744   ;;  %v1298_v0 = vmov 0.0|0.0   ;;  %vm1299_vm2 = vmmov 0   ;;  %s1301_s11 = smov 64   ;;  %s1303_s25 = smov 96   ;;  %s1515_s2 = inlined_call_operand.vmem [shape: f32[32,128], index: 2, kind: input, shape index: {}]   ;;  %s1516_s1 = inlined_call_operand.vmem [shape: f32[4,128], index: 1, kind: input, shape index: {}]   ;;  %s1517_s0 = inlined_call_operand.vmem [shape: f32[64,4], index: 0, kind: input, shape index: {}]   ;;  %s1518_s3 = inlined_call_operand.vmem [shape: f32[1,128], index: 3, kind: input, shape index: {}]   ;;  %s1519_s4 = inlined_call_operand.vmem [shape: f32[1,32], index: 4, kind: input, shape index: {}]   ;;  %s1520_s5 = inlined_call_operand.<no memory space> [shape: f32[1], index: 5, kind: input, shape index: {}]   ;;  %s1521_s6 = inlined_call_operand.vmem [shape: f32[8,1], index: 6, kind: output, shape index: {}]  }
   0x1   :  { %1196 = vmatprep.subr.bf16.mxu1 %v1298_v0  ;;  %v174_v1 = vld [vmem:[%s1515_s2] sm:$0xff]  ;;  %v175_v2 = vld [vmem:[%s1515_s2 + $0x8] sm:$0xff]  ;;  %v176_v7 = vld [vmem:[%s1515_s2 + $0x10] sm:$0xff]  ;;  %v1300_v8 = vmov 0.0   ;;  %vm178_vm3 = vcmask 261120   ;;  %vm1005_vm4 = vcmask 7168  }
   0x2   :  { %v32_v3 = vld [vmem:[%s1516_s1] sm:$0xf]  ;;  %v1349_v4 = vpack.c.bf16 %v175_v2, %v174_v1  ;;  %v25_v6 = vld [vmem:[%s1517_s0 + $0x8] sm:$0xff]  ;;  %1116 = vmatprep.mubr.msk.f32.mxu1 %vm1299_vm2, %v1300_v8  ;;  %v177_v9 = vld [vmem:[%s1515_s2 + $0x18] sm:$0xff] }
   0x3   :  { %1094 = vmatprep.subr.msk.mxu0 %vm65_vm0, %v32_v3  ;;  %v24_v5 = vld [vmem:[%s1517_s0] sm:$0xff]  ;;  %v1370_v10 = vpack.c.bf16 %v177_v9, %v176_v7  ;;  %v26_v48 = vld [vmem:[%s1517_s0 + $0x10] sm:$0xff]  ;;  %v27_v49 = vld [vmem:[%s1517_s0 + $0x18] sm:$0xff] }
   0x4   :  { %1095 = vmatpush3.msk.msra.mxu0 %vm65_vm0, %v32_v3  ;;  %1096 = vmatprep.mubr.msk.f32.mxu0 %vm40_vm1, %v24_v5  ;;  %v1390_v12 = vld [vmem:[%s1518_s3] ss:$0 sm:$0xff]  ;;  %s1302_s3 = smov 32   ;;  %v29_v51 = vld [vmem:[%s1517_s0 + $0x28] sm:$0xff]  ;;  %v30_v52 = vld [vmem:[%s1517_s0 + $0x30] sm:$0xff] }
   0x5   :  { %1198 = vmatpush3.bf16.msra.mxu1 %v1349_v4  ;;  %1097 = vmatmul.mubr.msk.f32.vlgmr.msra.gmra.mrb[0].mxu0 %vm40_vm1, %v25_v6  ;;  %v28_v50 = vld [vmem:[%s1517_s0 + $0x20] sm:$0xff]  ;;  %v31_v53 = vld [vmem:[%s1517_s0 + $0x38] sm:$0xff] }
   0x6   :  { %1199 = vmatprep.subr.bf16.mxu1 %v1298_v0  ;;  %1208 = vmatprep.subr.bf16.mxu0 %v1298_v0 }
   0x7   :  { %1210 = vmatpush3.bf16.msra.mxu0 %v1349_v4  ;;  %1099 = vmatprep.mubr.msk.f32.mxu0 %vm40_vm1, %v26_v48 }
   0x8   :  { %1211 = vmatprep.subr.bf16.mxu0 %v1298_v0 }
   0x9   :  { %1201 = vmatpush3.bf16.msra.mxu1 %v1370_v10  ;;  %1100 = vmatmul.mubr.msk.f32.gmra.mrb[2].mxu0 %vm40_vm1, %v27_v49 }
   0xa   :  { %1202 = vmatprep.subr.bf16.mxu1 %v1298_v0  ;;  %1102 = vmatprep.mubr.msk.f32.mxu0 %vm40_vm1, %v28_v50 }
   0xb   :  { %1213 = vmatpush3.bf16.msra.mxu0 %v1370_v10 }
   0xc   :  { %1117 = vmatmul.mubr.f32.vlgmr.msra.gmra.mrb[0].mxu1 %v1300_v8  ;;  %1220 = vmatprep.subr.bf16.mxu0 %v1298_v0 }
   0xd   :  { %1204 = vmatpush3.bf16.msra.mxu1 %v1349_v4  ;;  %1127 = vmatprep.mubr.msk.f32.mxu1 %vm1299_vm2, %v1300_v8 }
   0xe   :  { %1205 = vmatprep.subr.bf16.mxu1 %v1298_v0  ;;  %1103 = vmatmul.mubr.msk.f32.gmra.mrb[4].mxu0 %vm40_vm1, %v29_v51 }
   0xf   :  { %1105 = vmatprep.mubr.msk.f32.mxu0 %vm40_vm1, %v30_v52 }
  0x11   :  { %1207 = vmatpush3.bf16.msra.mxu1 %v1370_v10 }
  0x12   :  { %1214 = vmatprep.subr.bf16.mxu1 %v1298_v0  ;;  %1106 = vmatmul.mubr.msk.f32.gmra.mrb[6].mxu0 %vm40_vm1, %v31_v53 }
  0x13   :  { %1138 = vmatprep.mubr.msk.f32.mxu0 %vm1299_vm2, %v1300_v8 }
  0xd8   :  { %v1098_v11 = vpop.f32.mrb[0].mxu0 }
  0xd9   :  { %v135_v13 = vpop.f32.mrb[1].mxu0  ;;  %v141_v33 = vadd.f32 %v1098_v11, %v1390_v12 }
  0xda   :  { %v136_v14 = vadd.f32 %v1390_v12, %v135_v13 }
  0xdc   :  { %v1101_v57 = vpop.f32.mrb[2].mxu0 }
  0xdd   :  { %v145_v58 = vpop.f32.mrb[3].mxu0 }
  0xde   :  { %v146_v1 = vadd.f32 %v1390_v12, %v145_v58 }
  0xdf   :  { %v248_v15 = vpop.f32.mrb[0].mxu1 }
  0xe0   :  { %v252_v16 = vadd.f32 %v248_v15, %v136_v14  ;;  %v1118_v17 = vpop.f32.mrb[1].mxu1 }
  0xe1   :  { %v1435_v59 = vpop.f32.mrb[4].mxu0 }
  0xe2   :  { %v1021_v18 = vmul.f32 -1.442695, %v252_v16  ;;  %v1437_v60 = vpop.f32.mrb[5].mxu0 }
  0xe4   :  { %1250 = vpow2.f32 %v1021_v18 }
  0xe5   :  { %v1439_v61 = vpop.f32.mrb[6].mxu0 }
  0xe6   :  { %v1441_v62 = vpop.f32.mrb[7].mxu0 }
  0xee   :  { %v1251_v19 = vpop.eup %1250 }
  0xef   :  { %v256_v20 = vadd.f32 1.0, %v1251_v19 }
  0xf1   :  { %1252 = vrcp.f32 %v256_v20 }
  0xfb   :  { %v1253_v21 = vpop.eup %1252 }
  0xfc   :  { %v259_v22 = vmul.f32 2.0, %v1253_v21  ;;  %v261_v26 = vmul.f32 0.0, %v1253_v21 }
  0xfe   :  { %v1022_v23 = vadd.f32 -1.0, %v259_v22 }
 0x100   :  { %263 = vrot.lane.b32.xlu0 %v1022_v23, %s1301_s11 }
 0x172   :  { %v264_v24 = vpop.permute.xlu0 %263 }
 0x173   :  { %v266_v25 = vmul.f32 %v1253_v21, %v264_v24  ;;  %v151_v24 = vadd.f32 %v1101_v57, %v1390_v12 }
 0x175   :  { %268 = vrot.lane.b32.xlu0 %v266_v25, %s1302_s3 }
 0x1e7   :  { %v269_v27 = vpop.permute.xlu0 %268 }
 0x1e8   :  { %v271_v28 = vadd.f32 %v269_v27, %v261_v26 }
 0x1ea   :  { %1254 = vtanh.f32 %v271_v28 }
 0x1f4   :  { %v1255_v29 = vpop.eup %1254 }
 0x1f5   :  { %274 = vrot.lane.b32.xlu1 %v1255_v29, %s1301_s11 }
 0x267   :  { %v275_v30 = vpop.permute.xlu1 %274 }
 0x268   :  { %v277_v31 = vmul.f32 %v1253_v21, %v275_v30 }
 0x26a   :  { %279 = vrot.lane.b32.xlu1 %v277_v31, %s1302_s3 }
 0x2dc   :  { %v280_v32 = vpop.permute.xlu1 %279 }
 0x2dd   :  { %1128 = vmatmul.mubr.msk.f32.vlgmr.msra.gmra.mrb[2].mxu1 %vm178_vm3, %v280_v32 }
 0x2de   :  { %1216 = vmatpush3.bf16.msra.mxu1 %v1349_v4  ;;  %1149 = vmatprep.mubr.msk.f32.mxu1 %vm1299_vm2, %v1300_v8 }
 0x2df   :  { %1217 = vmatprep.subr.bf16.mxu1 %v1298_v0 }
 0x2e2   :  { %1219 = vmatpush3.bf16.msra.mxu1 %v1370_v10 }
 0x2e3   :  { %1226 = vmatprep.subr.bf16.mxu1 %v1298_v0 }
 0x3b0   :  { %v349_v34 = vpop.f32.mrb[2].mxu1 }
 0x3b1   :  { %v353_v35 = vadd.f32 %v349_v34, %v141_v33  ;;  %v1129_v36 = vpop.f32.mrb[3].mxu1 }
 0x3b3   :  { %v1024_v37 = vmul.f32 -1.442695, %v353_v35 }
 0x3b5   :  { %1256 = vpow2.f32 %v1024_v37 }
 0x3bf   :  { %v1257_v38 = vpop.eup %1256 }
 0x3c0   :  { %v357_v39 = vadd.f32 1.0, %v1257_v38 }
 0x3c2   :  { %1258 = vrcp.f32 %v357_v39 }
 0x3cc   :  { %v1259_v40 = vpop.eup %1258 }
 0x3cd   :  { %v360_v41 = vmul.f32 2.0, %v1259_v40  ;;  %v362_v45 = vmul.f32 %v1259_v40, %v271_v28 }
 0x3cf   :  { %v1025_v42 = vadd.f32 -1.0, %v360_v41 }
 0x3d1   :  { %364 = vrot.lane.b32.xlu0 %v1025_v42, %s1301_s11 }
 0x443   :  { %v365_v43 = vpop.permute.xlu0 %364 }
 0x444   :  { %v367_v44 = vmul.f32 %v1259_v40, %v365_v43  ;;  %v156_v43 = vadd.f32 %v1390_v12, %v1437_v60 }
 0x446   :  { %369 = vrot.lane.b32.xlu1 %v367_v44, %s1302_s3 }
 0x4b8   :  { %v370_v46 = vpop.permute.xlu1 %369 }
 0x4b9   :  { %v372_v47 = vadd.f32 %v370_v46, %v362_v45 }
 0x4bb   :  { %1260 = vtanh.f32 %v372_v47 }
 0x4c5   :  { %v1261_v54 = vpop.eup %1260 }
 0x4c6   :  { %375 = vrot.lane.b32.xlu0 %v1261_v54, %s1301_s11 }
 0x538   :  { %v376_v55 = vpop.permute.xlu0 %375 }
 0x539   :  { %v378_v56 = vmul.f32 %v1259_v40, %v376_v55 }
 0x53b   :  { %380 = vrot.lane.b32.xlu1 %v378_v56, %s1302_s3 }
 0x5ad   :  { %v381_v63 = vpop.permute.xlu1 %380 }
 0x5ae   :  { %1139 = vmatmul.mubr.msk.f32.vlgmr.msra.gmra.mrb[8].mxu0 %vm178_vm3, %v381_v63 }
 0x5af   :  { %1222 = vmatpush3.bf16.msra.mxu0 %v1349_v4  ;;  %1160 = vmatprep.mubr.msk.f32.mxu0 %vm1299_vm2, %v1300_v8 }
 0x5b0   :  { %1223 = vmatprep.subr.bf16.mxu0 %v1298_v0 }
 0x5b3   :  { %1225 = vmatpush3.bf16.msra.mxu0 %v1370_v10 }
 0x5b4   :  { %1232 = vmatprep.subr.bf16.mxu0 %v1298_v0 }
 0x681   :  { %v450_v2 = vpop.f32.mrb[8].mxu0 }
 0x682   :  { %v454_v3 = vadd.f32 %v450_v2, %v146_v1  ;;  %v1140_v5 = vpop.f32.mrb[9].mxu0  ;;  %v161_v2 = vadd.f32 %v1435_v59, %v1390_v12 }
 0x684   :  { %v1027_v6 = vmul.f32 -1.442695, %v454_v3 }
 0x686   :  { %1262 = vpow2.f32 %v1027_v6 }
 0x690   :  { %v1263_v7 = vpop.eup %1262 }
 0x691   :  { %v458_v9 = vadd.f32 1.0, %v1263_v7 }
 0x693   :  { %1264 = vrcp.f32 %v458_v9 }
 0x69d   :  { %v1265_v11 = vpop.eup %1264 }
 0x69e   :  { %v461_v13 = vmul.f32 2.0, %v1265_v11  ;;  %v463_v17 = vmul.f32 %v1265_v11, %v372_v47 }
 0x6a0   :  { %v1028_v14 = vadd.f32 -1.0, %v461_v13 }
 0x6a2   :  { %465 = vrot.lane.b32.xlu0 %v1028_v14, %s1301_s11 }
 0x714   :  { %v466_v15 = vpop.permute.xlu0 %465 }
 0x715   :  { %v468_v16 = vmul.f32 %v1265_v11, %v466_v15 }
 0x717   :  { %470 = vrot.lane.b32.xlu1 %v468_v16, %s1302_s3 }
 0x789   :  { %v471_v18 = vpop.permute.xlu1 %470 }
 0x78a   :  { %v473_v19 = vadd.f32 %v471_v18, %v463_v17 }
 0x78c   :  { %1266 = vtanh.f32 %v473_v19 }
 0x796   :  { %v1267_v20 = vpop.eup %1266 }
 0x797   :  { %476 = vrot.lane.b32.xlu0 %v1267_v20, %s1301_s11  ;;  %v166_v20 = vadd.f32 %v1390_v12, %v1441_v62 }
 0x809   :  { %v477_v21 = vpop.permute.xlu0 %476 }
 0x80a   :  { %v479_v22 = vmul.f32 %v1265_v11, %v477_v21 }
 0x80c   :  { %481 = vrot.lane.b32.xlu1 %v479_v22, %s1302_s3 }
 0x87e   :  { %v482_v23 = vpop.permute.xlu1 %481 }
 0x87f   :  { %1150 = vmatmul.mubr.msk.f32.vlgmr.msra.gmra.mrb[4].mxu1 %vm178_vm3, %v482_v23 }
 0x880   :  { %1228 = vmatpush3.bf16.msra.mxu1 %v1349_v4  ;;  %1171 = vmatprep.mubr.msk.f32.mxu1 %vm1299_vm2, %v1300_v8 }
 0x881   :  { %1229 = vmatprep.subr.bf16.mxu1 %v1298_v0 }
 0x884   :  { %1231 = vmatpush3.bf16.msra.mxu1 %v1370_v10 }
 0x885   :  { %1238 = vmatprep.subr.bf16.mxu1 %v1298_v0 }
 0x952   :  { %v551_v25 = vpop.f32.mrb[4].mxu1 }
 0x953   :  { %v555_v26 = vadd.f32 %v551_v25, %v151_v24  ;;  %v1151_v27 = vpop.f32.mrb[5].mxu1 }
 0x955   :  { %v1030_v28 = vmul.f32 -1.442695, %v555_v26 }
 0x957   :  { %1268 = vpow2.f32 %v1030_v28 }
 0x961   :  { %v1269_v29 = vpop.eup %1268 }
 0x962   :  { %v559_v30 = vadd.f32 1.0, %v1269_v29 }
 0x964   :  { %1270 = vrcp.f32 %v559_v30 }
 0x96e   :  { %v1271_v31 = vpop.eup %1270 }
 0x96f   :  { %v562_v32 = vmul.f32 2.0, %v1271_v31  ;;  %v564_v36 = vmul.f32 %v1271_v31, %v473_v19 }
 0x971   :  { %v1031_v33 = vadd.f32 -1.0, %v562_v32 }
 0x973   :  { %566 = vrot.lane.b32.xlu0 %v1031_v33, %s1301_s11 }
 0x9e5   :  { %v567_v34 = vpop.permute.xlu0 %566 }
 0x9e6   :  { %v569_v35 = vmul.f32 %v1271_v31, %v567_v34 }
 0x9e8   :  { %571 = vrot.lane.b32.xlu1 %v569_v35, %s1302_s3 }
 0xa5a   :  { %v572_v37 = vpop.permute.xlu1 %571 }
 0xa5b   :  { %v574_v38 = vadd.f32 %v572_v37, %v564_v36 }
 0xa5d   :  { %1272 = vtanh.f32 %v574_v38 }
 0xa67   :  { %v1273_v39 = vpop.eup %1272 }
 0xa68   :  { %577 = vrot.lane.b32.xlu0 %v1273_v39, %s1301_s11 }
 0xada   :  { %v578_v40 = vpop.permute.xlu0 %577 }
 0xadb   :  { %v580_v41 = vmul.f32 %v1271_v31, %v578_v40 }
 0xadd   :  { %582 = vrot.lane.b32.xlu1 %v580_v41, %s1302_s3 }
 0xb4f   :  { %v583_v42 = vpop.permute.xlu1 %582 }
 0xb50   :  { %1161 = vmatmul.mubr.msk.f32.vlgmr.msra.gmra.mrb[10].mxu0 %vm178_vm3, %v583_v42 }
 0xb51   :  { %1234 = vmatpush3.bf16.msra.mxu0 %v1349_v4  ;;  %1182 = vmatprep.mubr.msk.f32.mxu0 %vm1299_vm2, %v1300_v8 }
 0xb52   :  { %1235 = vmatprep.subr.bf16.mxu0 %v1298_v0 }
 0xb55   :  { %1237 = vmatpush3.bf16.msra.mxu0 %v1370_v10 }
 0xc23   :  { %v652_v44 = vpop.f32.mrb[10].mxu0 }
 0xc24   :  { %v656_v45 = vadd.f32 %v652_v44, %v156_v43  ;;  %v1162_v46 = vpop.f32.mrb[11].mxu0 }
 0xc26   :  { %v1033_v47 = vmul.f32 -1.442695, %v656_v45 }
 0xc28   :  { %1274 = vpow2.f32 %v1033_v47 }
 0xc32   :  { %v1275_v48 = vpop.eup %1274 }
 0xc33   :  { %v660_v49 = vadd.f32 1.0, %v1275_v48 }
 0xc35   :  { %1276 = vrcp.f32 %v660_v49 }
 0xc3f   :  { %v1277_v50 = vpop.eup %1276 }
 0xc40   :  { %v663_v51 = vmul.f32 2.0, %v1277_v50  ;;  %v665_v55 = vmul.f32 %v1277_v50, %v574_v38  ;;  %v171_v38 = vadd.f32 %v1439_v61, %v1390_v12  ;;  %v1044_v12 = vld [vmem:[%s1519_s4] ss:$0 sm:$0xff] }
 0xc42   :  { %v1034_v52 = vadd.f32 -1.0, %v663_v51 }
 0xc44   :  { %667 = vrot.lane.b32.xlu0 %v1034_v52, %s1301_s11 }
 0xcb6   :  { %v668_v53 = vpop.permute.xlu0 %667 }
 0xcb7   :  { %v670_v54 = vmul.f32 %v1277_v50, %v668_v53 }
 0xcb9   :  { %672 = vrot.lane.b32.xlu1 %v670_v54, %s1302_s3 }
 0xd2b   :  { %v673_v56 = vpop.permute.xlu1 %672 }
 0xd2c   :  { %v675_v57 = vadd.f32 %v673_v56, %v665_v55 }
 0xd2e   :  { %1278 = vtanh.f32 %v675_v57 }
 0xd38   :  { %v1279_v58 = vpop.eup %1278 }
 0xd39   :  { %678 = vrot.lane.b32.xlu0 %v1279_v58, %s1301_s11 }
 0xdab   :  { %v679_v60 = vpop.permute.xlu0 %678 }
 0xdac   :  { %v681_v63 = vmul.f32 %v1277_v50, %v679_v60  ;;  %v1003_v60 = vstv %s1520_s5 }
 0xdae   :  { %683 = vrot.lane.b32.xlu1 %v681_v63, %s1302_s3 }
 0xe20   :  { %v684_v1 = vpop.permute.xlu1 %683 }
 0xe21   :  { %1172 = vmatmul.mubr.msk.f32.vlgmr.msra.gmra.mrb[6].mxu1 %vm178_vm3, %v684_v1 }
 0xe22   :  { %1240 = vmatpush3.bf16.msra.mxu1 %v1349_v4  ;;  %1193 = vmatprep.mubr.msk.f32.mxu1 %vm1299_vm2, %v1300_v8 }
 0xe23   :  { %1241 = vmatprep.subr.bf16.mxu1 %v1298_v0 }
 0xe26   :  { %1243 = vmatpush3.bf16.msra.mxu1 %v1370_v10 }
 0xef4   :  { %v753_v3 = vpop.f32.mrb[6].mxu1 }
 0xef5   :  { %v757_v5 = vadd.f32 %v753_v3, %v161_v2  ;;  %v1173_v6 = vpop.f32.mrb[7].mxu1 }
 0xef7   :  { %v1036_v7 = vmul.f32 -1.442695, %v757_v5 }
 0xef9   :  { %1280 = vpow2.f32 %v1036_v7 }
 0xf03   :  { %v1281_v9 = vpop.eup %1280 }
 0xf04   :  { %v761_v11 = vadd.f32 1.0, %v1281_v9 }
 0xf06   :  { %1282 = vrcp.f32 %v761_v11 }
 0xf10   :  { %v1283_v13 = vpop.eup %1282 }
 0xf11   :  { %v764_v4 = vmul.f32 2.0, %v1283_v13  ;;  %v766_v10 = vmul.f32 %v1283_v13, %v675_v57 }
 0xf13   :  { %v1037_v14 = vadd.f32 -1.0, %v764_v4 }
 0xf15   :  { %768 = vrot.lane.b32.xlu0 %v1037_v14, %s1301_s11 }
 0xf87   :  { %v769_v8 = vpop.permute.xlu0 %768 }
 0xf88   :  { %v771_v0 = vmul.f32 %v1283_v13, %v769_v8 }
 0xf8a   :  { %773 = vrot.lane.b32.xlu1 %v771_v0, %s1302_s3 }
 0xffc   :  { %v774_v15 = vpop.permute.xlu1 %773 }
 0xffd   :  { %v776_v59 = vadd.f32 %v774_v15, %v766_v10 }
 0xfff   :  { %1284 = vtanh.f32 %v776_v59 }
0x1009   :  { %v1285_v16 = vpop.eup %1284 }
0x100a   :  { %779 = vrot.lane.b32.xlu0 %v1285_v16, %s1301_s11 }
0x107c   :  { %v780_v17 = vpop.permute.xlu0 %779 }
0x107d   :  { %v782_v18 = vmul.f32 %v1283_v13, %v780_v17 }
0x107f   :  { %784 = vrot.lane.b32.xlu1 %v782_v18, %s1302_s3 }
0x10f1   :  { %v785_v19 = vpop.permute.xlu1 %784 }
0x10f2   :  { %1183 = vmatmul.mubr.msk.f32.vlgmr.msra.gmra.mrb[12].mxu0 %vm178_vm3, %v785_v19 }
0x11c5   :  { %v854_v21 = vpop.f32.mrb[12].mxu0 }
0x11c6   :  { %v858_v22 = vadd.f32 %v854_v21, %v166_v20  ;;  %v1184_v23 = vpop.f32.mrb[13].mxu0 }
0x11c8   :  { %v1039_v24 = vmul.f32 -1.442695, %v858_v22 }
0x11ca   :  { %1286 = vpow2.f32 %v1039_v24 }
0x11d4   :  { %v1287_v25 = vpop.eup %1286 }
0x11d5   :  { %v862_v26 = vadd.f32 1.0, %v1287_v25 }
0x11d7   :  { %1288 = vrcp.f32 %v862_v26 }
0x11e1   :  { %v1289_v27 = vpop.eup %1288 }
0x11e2   :  { %v865_v28 = vmul.f32 2.0, %v1289_v27  ;;  %v867_v32 = vmul.f32 %v1289_v27, %v776_v59 }
0x11e4   :  { %v1040_v29 = vadd.f32 -1.0, %v865_v28 }
0x11e6   :  { %869 = vrot.lane.b32.xlu0 %v1040_v29, %s1301_s11 }
0x1258   :  { %v870_v30 = vpop.permute.xlu0 %869 }
0x1259   :  { %v872_v31 = vmul.f32 %v1289_v27, %v870_v30 }
0x125b   :  { %874 = vrot.lane.b32.xlu1 %v872_v31, %s1302_s3 }
0x12cd   :  { %v875_v33 = vpop.permute.xlu1 %874 }
0x12ce   :  { %v877_v62 = vadd.f32 %v875_v33, %v867_v32 }
0x12d0   :  { %1290 = vtanh.f32 %v877_v62 }
0x12da   :  { %v1291_v34 = vpop.eup %1290 }
0x12db   :  { %880 = vrot.lane.b32.xlu0 %v1291_v34, %s1301_s11 }
0x134d   :  { %v881_v35 = vpop.permute.xlu0 %880 }
0x134e   :  { %v883_v36 = vmul.f32 %v1289_v27, %v881_v35 }
0x1350   :  { %885 = vrot.lane.b32.xlu1 %v883_v36, %s1302_s3 }
0x13c2   :  { %v886_v37 = vpop.permute.xlu1 %885 }
0x13c3   :  { %1194 = vmatmul.mubr.msk.f32.vlgmr.msra.gmra.mrb[8].mxu1 %vm178_vm3, %v886_v37 }
0x1496   :  { %v955_v39 = vpop.f32.mrb[8].mxu1 }
0x1497   :  { %v959_v40 = vadd.f32 %v955_v39, %v171_v38  ;;  %v1195_v41 = vpop.f32.mrb[9].mxu1 }
0x1499   :  { %v1042_v42 = vmul.f32 -1.442695, %v959_v40 }
0x149b   :  { %1292 = vpow2.f32 %v1042_v42 }
0x14a5   :  { %v1293_v43 = vpop.eup %1292 }
0x14a6   :  { %v963_v44 = vadd.f32 1.0, %v1293_v43 }
0x14a8   :  { %1294 = vrcp.f32 %v963_v44 }
0x14b2   :  { %v1295_v45 = vpop.eup %1294 }
0x14b3   :  { %v966_v46 = vmul.f32 2.0, %v1295_v45  ;;  %v968_v61 = vmul.f32 %v1295_v45, %v877_v62 }
0x14b5   :  { %v1043_v47 = vadd.f32 -1.0, %v966_v46 }
0x14b7   :  { %970 = vrot.lane.b32.xlu0 %v1043_v47, %s1301_s11 }
0x1529   :  { %v971_v48 = vpop.permute.xlu0 %970 }
0x152a   :  { %v973_v49 = vmul.f32 %v1295_v45, %v971_v48 }
0x152c   :  { %975 = vrot.lane.b32.xlu1 %v973_v49, %s1302_s3 }
0x1530   :  { %991 = vrot.lane.b32.xlu1 %v1044_v12, %s1303_s25 }
0x159e   :  { %v976_v50 = vpop.permute.xlu1 %975 }
0x159f   :  { %v978_v51 = vadd.f32 %v976_v50, %v968_v61 }
0x15a1   :  { %1296 = vtanh.f32 %v978_v51 }
0x15a2   :  { %v992_v54 = vpop.permute.xlu1 %991 }
0x15ab   :  { %v1297_v52 = vpop.eup %1296 }
0x15ac   :  { %981 = vrot.lane.b32.xlu0 %v1297_v52, %s1301_s11 }
0x161e   :  { %v982_v53 = vpop.permute.xlu0 %981 }
0x161f   :  { %v984_v55 = vmul.f32 %v1295_v45, %v982_v53 }
0x1621   :  { %v994_v56 = vmul.f32 %v992_v54, %v984_v55 }
0x1623   :  { %996 = vrot.lane.b32.xlu0 %v994_v56, %s1302_s3 }
0x1695   :  { %v997_v57 = vpop.permute.xlu0 %996 }
0x1696   :  { %v999_v58 = vsel %vm178_vm3, %v997_v57, 0.0 }
0x1697   :  { %1000 = vadd.xlane.f32.xlu1 %v999_v58 }
0x1724   :  { %v1001_v63 = vpop.xlane.xlu1 %1000 }
0x1725   :  { %v1004_v1 = vadd.f32 %v1003_v60, %v1001_v63 }
0x1727   :  { %1006 = vst.msk [vmem:[%s1521_s6] sm:$0xff] %vm1005_vm4, %v1004_v1 }

</bundles_post_ra>
